<compile_context>
chip_gen: v7x
topology: tpu7x:2x2x1
jax: 0.10.0
libtpu: 0.0.40
codegen_flags: <defaults>
</compile_context>

<pallas_src>
import math

import jax
import jax.numpy as jnp
from jax.experimental import pallas as pl
from jax.experimental.pallas import tpu as pltpu


def _round_up(n, m):
    return (n + m - 1) // m * m


def qnet_kernel(x_ref, a_ref, w1o_ref, w1a_ref, b1_ref, w2_ref, b2_ref,
                w3_ref, b3_ref, out_ref):
    # ----- fc1 (concat folded into split weights) + ReLU --------------------
    x = x_ref[...].astype(jnp.bfloat16)                       # (TB, obs)
    a = a_ref[...].astype(jnp.bfloat16)                       # (TB, act)
    h1 = jnp.dot(x, w1o_ref[...], preferred_element_type=jnp.float32)
    h1 = h1 + jnp.dot(a, w1a_ref[...], preferred_element_type=jnp.float32)
    h1 = jnp.maximum(h1 + b1_ref[...], 0.0)                   # (TB, 256) f32

    # ----- fc2 + ReLU --------------------------------------------------------
    h2 = jnp.dot(h1.astype(jnp.bfloat16), w2_ref[...],
                 preferred_element_type=jnp.float32)
    h2 = jnp.maximum(h2 + b2_ref[...], 0.0)                   # (TB, 256) f32

    # ----- fc3, emitted lane-dense as (1, TB) --------------------------------
    # w3 keeps PyTorch (out=1, in=256) layout; contract its feature axis against
    # h2's feature axis (A @ B^T, the q@k.T pattern) so the result lands on lanes.
    q = jax.lax.dot_general(
        w3_ref[...], h2.astype(jnp.bfloat16),
        dimension_numbers=(((1,), (1,)), ((), ())),
        preferred_element_type=jnp.float32)                   # (1, TB)
    out_ref[...] = (q + b3_ref[...]).astype(out_ref.dtype)


def _choose_tile_b(B, tile_b):
    """Pick a legal, efficient batch tile without any host-side padding."""
    if B >= 256:
        # Multi-block regime: tiles are multiples of 128 (legal sublane/lane block dims
        # and dense (1, tb) output stores even when B is not divisible); cap at
        # ceil(B/2) so the parallel grid axis has >= 2 steps (v7x dual TensorCore).
        tb = min(tile_b, _round_up(-(-B // 2), 128))
        return max(128, (tb // 128) * 128)
    # Single-block regime: one (possibly partial) 8-aligned block covering the batch.
    return _round_up(B, 8)


def qnetwork_forward(x, a, params, tile_b=2048):
    """x: (B, obs_dim) f32, a: (B, act_dim) f32 -> (B, 1) f32."""
    w1o, w1a, b1, w2, b2, w3, b3 = params
    B, obs_dim = x.shape
    act_dim = a.shape[1]
    hidden = w2.shape[0]
    d = obs_dim + act_dim

    tb = _choose_tile_b(B, tile_b)
    num_blocks = pl.cdiv(B, tb)       # final block may be partial (no host pad)

    def resident(shape):
        # Weight/bias blocks: full array, constant block index -> stays in VMEM
        # across grid steps (no re-DMA).
        return pl.BlockSpec(shape, lambda i: (0, 0))

    grid_spec = pltpu.PrefetchScalarGridSpec(
        num_scalar_prefetch=0,
        grid=(num_blocks,),
        in_specs=[
            pl.BlockSpec((tb, obs_dim), lambda i: (i, 0)),   # x block
            pl.BlockSpec((tb, act_dim), lambda i: (i, 0)),   # a block
            resident((obs_dim, hidden)),                     # W1_obs
            resident((act_dim, hidden)),                     # W1_act
            resident((1, hidden)),                           # b1
            resident((hidden, hidden)),                      # W2
            resident((1, hidden)),                           # b2
            resident((1, hidden)),                           # W3 (PyTorch (1, 256) layout)
            resident((1, 1)),                                # b3
        ],
        out_specs=pl.BlockSpec((1, tb), lambda i: (0, i)),   # lane-dense (1, TB) slab
    )

    flops = 2 * B * (d * hidden + hidden * hidden + hidden)
    bytes_accessed = int(
        x.size * x.dtype.itemsize + a.size * a.dtype.itemsize
        + sum(int(p.size) * p.dtype.itemsize for p in params)
        + B * 4)

    q_row = pl.pallas_call(
        qnet_kernel,
        out_shape=jax.ShapeDtypeStruct((1, B), jnp.float32),
        grid_spec=grid_spec,
        compiler_params=pltpu.CompilerParams(
            dimension_semantics=("parallel",),
            # Large tiles need more than v5e's 16 MiB default scoped limit; actual use
            # (~10-12 MiB at tb=2048) stays well under v7x's 64 MiB physical VMEM.
            vmem_limit_bytes=64 * 1024 * 1024),
        cost_estimate=pl.CostEstimate(
            flops=flops, transcendentals=0, bytes_accessed=bytes_accessed),
    )(x, a, w1o, w1a, b1, w2, b2, w3, b3)

    # (1, B) -> (B, 1): contiguous reshape, no padding to slice off.
    return q_row.reshape(B, 1)


def init_params(key, obs_dim, act_dim, hidden=256):
    """PyTorch-style uniform(-1/sqrt(fan_in), 1/sqrt(fan_in)) init.

    Weights are stored bf16 (MXU operands); biases stay f32.  fc1 is stored split
    (obs part / act part) in (in, out) layout; fc3 keeps PyTorch (out, in) layout.
    """
    d = obs_dim + act_dim

    def uniform(k, shape, bound, dtype):
        return jax.random.uniform(k, shape, jnp.float32, -bound, bound).astype(dtype)

    k = jax.random.split(key, 7)
    bound1 = 1.0 / math.sqrt(d)
    bound2 = 1.0 / math.sqrt(hidden)
    w1o = uniform(k[0], (obs_dim, hidden), bound1, jnp.bfloat16)
    w1a = uniform(k[1], (act_dim, hidden), bound1, jnp.bfloat16)
    b1 = uniform(k[2], (1, hidden), bound1, jnp.float32)
    w2 = uniform(k[3], (hidden, hidden), bound2, jnp.bfloat16)
    b2 = uniform(k[4], (1, hidden), bound2, jnp.float32)
    w3 = uniform(k[5], (1, hidden), bound2, jnp.bfloat16)   # fc3 weight, (out=1, in=256)
    b3 = uniform(k[6], (1, 1), bound2, jnp.float32)
    return (w1o, w1a, b1, w2, b2, w3, b3)


def _reference(x, a, params):
    """Pure-JAX reference mirroring the kernel numerics (bf16 operands, f32 accum)."""
    w1o, w1a, b1, w2, b2, w3, b3 = params
    bf = jnp.bfloat16
    h1 = (jnp.dot(x.astype(bf), w1o, preferred_element_type=jnp.float32)
          + jnp.dot(a.astype(bf), w1a, preferred_element_type=jnp.float32))
    h1 = jnp.maximum(h1 + b1, 0.0)
    h2 = jnp.dot(h1.astype(bf), w2, preferred_element_type=jnp.float32)
    h2 = jnp.maximum(h2 + b2, 0.0)
    return jnp.dot(h2.astype(bf), w3.T, preferred_element_type=jnp.float32) + b3


if __name__ == "__main__":
    key = jax.random.PRNGKey(0)
    k_obs, k_act, k_par, k_obs2, k_act2 = jax.random.split(key, 5)

    obs_dim, act_dim = 17, 6                    # HalfCheetah-like dims
    params = init_params(k_par, obs_dim, act_dim)

    # Small single-block case (B=8 -> one (8, D) tile).
    batch = 8
    x = jax.random.normal(k_obs, (batch, obs_dim), jnp.float32)
    a = jax.random.normal(k_act, (batch, act_dim), jnp.float32)
    q = qnetwork_forward(x, a, params)
    jax.block_until_ready(q)
    assert q.shape == (batch, 1)
    assert jnp.allclose(q, _reference(x, a, params), atol=1e-3, rtol=1e-3)

    # Multi-block case exercising the batch grid, >=2 parallel steps, and the
    # un-padded partial final block (B=300 -> tiles of 256 + partial 44).
    batch2 = 300
    x2 = jax.random.normal(k_obs2, (batch2, obs_dim), jnp.float32)
    a2 = jax.random.normal(k_act2, (batch2, act_dim), jnp.float32)
    q2 = qnetwork_forward(x2, a2, params)
    jax.block_until_ready(q2)
    assert q2.shape == (batch2, 1)
    assert jnp.allclose(q2, _reference(x2, a2, params), atol=1e-3, rtol=1e-3)

    print("KERNEL_OK")
</pallas_src>

<mosaic_0001>
module attributes {stable_mosaic.version = 11 : i64} {
  func.func @qnet_kernel(%arg0: i32, %arg1: memref<8x17xf32, #tpu.memory_space<vmem>>, %arg2: memref<8x6xf32, #tpu.memory_space<vmem>>, %arg3: memref<17x256xbf16, #tpu.memory_space<vmem>>, %arg4: memref<6x256xbf16, #tpu.memory_space<vmem>>, %arg5: memref<1x256xf32, #tpu.memory_space<vmem>>, %arg6: memref<256x256xbf16, #tpu.memory_space<vmem>>, %arg7: memref<1x256xf32, #tpu.memory_space<vmem>>, %arg8: memref<1x256xbf16, #tpu.memory_space<vmem>>, %arg9: memref<1x1xf32, #tpu.memory_space<vmem>>, %arg10: memref<1x8xf32, #tpu.memory_space<vmem>>) attributes {dimension_semantics = [#tpu.dimension_semantics<parallel>], iteration_bounds = array<i64: 1>, scalar_prefetch = 0 : i64, scratch_operands = 0 : i64, tpu.core_type = #tpu.core_type<tc>, window_params = [{transform_indices = @transform_0, window_bounds = array<i64: 8, 17>}, {transform_indices = @transform_1, window_bounds = array<i64: 8, 6>}, {pipeline_mode = #tpu.pipeline_mode<synchronous>, transform_indices = @transform_2, window_bounds = array<i64: 17, 256>}, {pipeline_mode = #tpu.pipeline_mode<synchronous>, transform_indices = @transform_3, window_bounds = array<i64: 6, 256>}, {pipeline_mode = #tpu.pipeline_mode<synchronous>, transform_indices = @transform_4, window_bounds = array<i64: 1, 256>}, {pipeline_mode = #tpu.pipeline_mode<synchronous>, transform_indices = @transform_5, window_bounds = array<i64: 256, 256>}, {pipeline_mode = #tpu.pipeline_mode<synchronous>, transform_indices = @transform_6, window_bounds = array<i64: 1, 256>}, {pipeline_mode = #tpu.pipeline_mode<synchronous>, transform_indices = @transform_7, window_bounds = array<i64: 1, 256>}, {pipeline_mode = #tpu.pipeline_mode<synchronous>, transform_indices = @transform_8, window_bounds = array<i64: 1, 1>}, {transform_indices = @transform_9, window_bounds = array<i64: 1, 8>}]} {
    %c0 = arith.constant 0 : index
    %c0_0 = arith.constant 0 : index
    %0 = vector.load %arg1[%c0, %c0_0] : memref<8x17xf32, #tpu.memory_space<vmem>>, vector<8x17xf32>
    %1 = arith.truncf %0 : vector<8x17xf32> to vector<8x17xbf16>
    %c0_1 = arith.constant 0 : index
    %c0_2 = arith.constant 0 : index
    %2 = vector.load %arg2[%c0_1, %c0_2] : memref<8x6xf32, #tpu.memory_space<vmem>>, vector<8x6xf32>
    %3 = arith.truncf %2 : vector<8x6xf32> to vector<8x6xbf16>
    %c0_3 = arith.constant 0 : index
    %c0_4 = arith.constant 0 : index
    %4 = vector.load %arg3[%c0_3, %c0_4] : memref<17x256xbf16, #tpu.memory_space<vmem>>, vector<17x256xbf16>
    %cst = arith.constant dense<0.000000e+00> : vector<8x256xf32>
    %5 = tpu.matmul %1, %4, %cst {dimension_numbers = #tpu.dot_dimension_numbers<[1], [0], [0], [1], [0, 0, 1, 1], [], []>} : vector<8x17xbf16>, vector<17x256xbf16>, vector<8x256xf32> -> vector<8x256xf32>
    %c0_5 = arith.constant 0 : index
    %c0_6 = arith.constant 0 : index
    %6 = vector.load %arg4[%c0_5, %c0_6] : memref<6x256xbf16, #tpu.memory_space<vmem>>, vector<6x256xbf16>
    %cst_7 = arith.constant dense<0.000000e+00> : vector<8x256xf32>
    %7 = tpu.matmul %3, %6, %cst_7 {dimension_numbers = #tpu.dot_dimension_numbers<[1], [0], [0], [1], [0, 0, 1, 1], [], []>} : vector<8x6xbf16>, vector<6x256xbf16>, vector<8x256xf32> -> vector<8x256xf32>
    %8 = arith.addf %5, %7 : vector<8x256xf32>
    %c0_8 = arith.constant 0 : index
    %c0_9 = arith.constant 0 : index
    %9 = vector.load %arg5[%c0_8, %c0_9] : memref<1x256xf32, #tpu.memory_space<vmem>>, vector<1x256xf32>
    %10 = vector.broadcast %9 : vector<1x256xf32> to vector<8x256xf32>
    %11 = arith.addf %8, %10 : vector<8x256xf32>
    %cst_10 = arith.constant 0.000000e+00 : f32
    %12 = vector.broadcast %cst_10 : f32 to vector<8x256xf32>
    %13 = arith.maximumf %11, %12 : vector<8x256xf32>
    %14 = arith.truncf %13 : vector<8x256xf32> to vector<8x256xbf16>
    %c0_11 = arith.constant 0 : index
    %c0_12 = arith.constant 0 : index
    %15 = vector.load %arg6[%c0_11, %c0_12] : memref<256x256xbf16, #tpu.memory_space<vmem>>, vector<256x256xbf16>
    %cst_13 = arith.constant dense<0.000000e+00> : vector<8x256xf32>
    %16 = tpu.matmul %14, %15, %cst_13 {dimension_numbers = #tpu.dot_dimension_numbers<[1], [0], [0], [1], [0, 0, 1, 1], [], []>} : vector<8x256xbf16>, vector<256x256xbf16>, vector<8x256xf32> -> vector<8x256xf32>
    %c0_14 = arith.constant 0 : index
    %c0_15 = arith.constant 0 : index
    %17 = vector.load %arg7[%c0_14, %c0_15] : memref<1x256xf32, #tpu.memory_space<vmem>>, vector<1x256xf32>
    %18 = vector.broadcast %17 : vector<1x256xf32> to vector<8x256xf32>
    %19 = arith.addf %16, %18 : vector<8x256xf32>
    %cst_16 = arith.constant 0.000000e+00 : f32
    %20 = vector.broadcast %cst_16 : f32 to vector<8x256xf32>
    %21 = arith.maximumf %19, %20 : vector<8x256xf32>
    %c0_17 = arith.constant 0 : index
    %c0_18 = arith.constant 0 : index
    %22 = vector.load %arg8[%c0_17, %c0_18] : memref<1x256xbf16, #tpu.memory_space<vmem>>, vector<1x256xbf16>
    %23 = arith.truncf %21 : vector<8x256xf32> to vector<8x256xbf16>
    %cst_19 = arith.constant dense<0.000000e+00> : vector<1x8xf32>
    %24 = tpu.matmul %22, %23, %cst_19 {dimension_numbers = #tpu.dot_dimension_numbers<[1], [1], [0], [0], [0, 0, 1, 0], [], []>} : vector<1x256xbf16>, vector<8x256xbf16>, vector<1x8xf32> -> vector<1x8xf32>
    %c0_20 = arith.constant 0 : index
    %c0_21 = arith.constant 0 : index
    %25 = vector.load %arg9[%c0_20, %c0_21] : memref<1x1xf32, #tpu.memory_space<vmem>>, vector<1x1xf32>
    %26 = vector.broadcast %25 : vector<1x1xf32> to vector<1x8xf32>
    %27 = arith.addf %24, %26 : vector<1x8xf32>
    %c0_22 = arith.constant 0 : index
    %c0_23 = arith.constant 0 : index
    %28 = vector.load %arg10[%c0_22, %c0_23] : memref<1x8xf32, #tpu.memory_space<vmem>>, vector<1x8xf32>
    tpu.vector_store %arg10[%c0_22, %c0_23], %27 {strides = array<i32>} : memref<1x8xf32, #tpu.memory_space<vmem>>, vector<1x8xf32>,
    return
  }
  func.func @transform_0(%arg0: i32) -> (i32, i32) {
    %c0_i32 = arith.constant 0 : i32
    %c0_i32_0 = arith.constant 0 : i32
    return %arg0, %c0_i32 : i32, i32
  }
  func.func @transform_1(%arg0: i32) -> (i32, i32) {
    %c0_i32 = arith.constant 0 : i32
    %c0_i32_0 = arith.constant 0 : i32
    return %arg0, %c0_i32 : i32, i32
  }
  func.func @transform_2(%arg0: i32) -> (i32, i32) {
    %c0_i32 = arith.constant 0 : i32
    %c0_i32_0 = arith.constant 0 : i32
    %c0_i32_1 = arith.constant 0 : i32
    return %c0_i32, %c0_i32_0 : i32, i32
  }
  func.func @transform_3(%arg0: i32) -> (i32, i32) {
    %c0_i32 = arith.constant 0 : i32
    %c0_i32_0 = arith.constant 0 : i32
    %c0_i32_1 = arith.constant 0 : i32
    return %c0_i32, %c0_i32_0 : i32, i32
  }
  func.func @transform_4(%arg0: i32) -> (i32, i32) {
    %c0_i32 = arith.constant 0 : i32
    %c0_i32_0 = arith.constant 0 : i32
    %c0_i32_1 = arith.constant 0 : i32
    return %c0_i32, %c0_i32_0 : i32, i32
  }
  func.func @transform_5(%arg0: i32) -> (i32, i32) {
    %c0_i32 = arith.constant 0 : i32
    %c0_i32_0 = arith.constant 0 : i32
    %c0_i32_1 = arith.constant 0 : i32
    return %c0_i32, %c0_i32_0 : i32, i32
  }
  func.func @transform_6(%arg0: i32) -> (i32, i32) {
    %c0_i32 = arith.constant 0 : i32
    %c0_i32_0 = arith.constant 0 : i32
    %c0_i32_1 = arith.constant 0 : i32
    return %c0_i32, %c0_i32_0 : i32, i32
  }
  func.func @transform_7(%arg0: i32) -> (i32, i32) {
    %c0_i32 = arith.constant 0 : i32
    %c0_i32_0 = arith.constant 0 : i32
    %c0_i32_1 = arith.constant 0 : i32
    return %c0_i32, %c0_i32_0 : i32, i32
  }
  func.func @transform_8(%arg0: i32) -> (i32, i32) {
    %c0_i32 = arith.constant 0 : i32
    %c0_i32_0 = arith.constant 0 : i32
    %c0_i32_1 = arith.constant 0 : i32
    return %c0_i32, %c0_i32_0 : i32, i32
  }
  func.func @transform_9(%arg0: i32) -> (i32, i32) {
    %c0_i32 = arith.constant 0 : i32
    %c0_i32_0 = arith.constant 0 : i32
    return %c0_i32, %arg0 : i32, i32
  }
}

</mosaic_0001>

<bundles_post_ra>
// kernel: tpu_custom_call.1
= control target key start
LH: loop header
LB: loop body
LE: loop exit
PB: predicated region body
PF: predicated region fallthrough
CT: control target
= control target key end

     0   :  { %s1132_s0 = inlined_call_operand.hbm [shape: f32[8,17], index: 0, kind: input, shape index: {}]   ;;  %s1133_s1 = inlined_call_operand.hbm [shape: f32[8,6], index: 1, kind: input, shape index: {}]   ;;  %s1134_s2 = inlined_call_operand.hbm [shape: bf16[17,256], index: 2, kind: input, shape index: {}]   ;;  %s1135_s3 = inlined_call_operand.hbm [shape: bf16[6,256], index: 3, kind: input, shape index: {}]   ;;  %s1136_s4 = inlined_call_operand.hbm [shape: f32[1,256], index: 4, kind: input, shape index: {}]   ;;  %s1137_s5 = inlined_call_operand.hbm [shape: bf16[256,256], index: 5, kind: input, shape index: {}]   ;;  %s1138_s6 = inlined_call_operand.hbm [shape: f32[1,256], index: 6, kind: input, shape index: {}]   ;;  %s1139_s7 = inlined_call_operand.hbm [shape: bf16[1,256], index: 7, kind: input, shape index: {}]   ;;  %s1140_s8 = inlined_call_operand.<no memory space> [shape: f32[1,1], index: 8, kind: input, shape index: {}]   ;;  %s1141_s9 = inlined_call_operand.hbm [shape: f32[1,8], index: 9, kind: output, shape index: {}]  }
   0x1   :  { %v14_v0 = vstv %s1140_s8 }
   0x2   :  { %15 = vst [vmem:[#allocation2] sm:$0x1] %v14_v0 }
   0x3   :  { %16 = vsyncpa [#allocation4], 0 }
   0x4   :  { %17 = vsyncpa [#allocation7], 0 }
   0x5   :  { %18 = vsyncpa [#allocation10], 0 }
   0x6   :  { %19 = vsyncpa [#allocation13], 0 }
   0x7   :  { %20 = vsyncpa [#allocation16], 0 }
   0x8   :  { %21 = vsyncpa [#allocation5], 0  ;;  %s952_s11 = smov [#allocation6]   ;;  %s953_s13 = smov [#allocation9]  }
   0x9   :  { %s38_s12 = sshll.u32 %s952_s11, 4  ;;  %s60_s14 = sshll.u32 %s953_s13, 4  ;;  %s39_s12 = int_to_ptr.vmem [resolvable:$true] %s38_s12  ;;  %s61_s14 = int_to_ptr.vmem [resolvable:$true] %s60_s14 }
   0xa   :  { %s742_s17 = scalar_lea.hbm %s1133_s1, 128 }
   0xb   :  { %p743_p0 = scmp.ne.s32.totalorder %s1133_s1, %s742_s17  ;;  %p746_p1 = scmp.lt.u32.totalorder %s742_s17, %s1133_s1 }
   0xd   :  { %p748_p2 = pnand %p746_p1, %p743_p0 }
   0xf   :  { %751 = shalt.err (!%p748_p2)
}
  0x10   :  { %s752_s21 = scalar_lea.vmem %s39_s12, 128  ;;  %p757_p4 = scmp.lt.s32.totalorder %s39_s12, %s39_s12 }
  0x11   :  { %p753_p3 = scmp.ne.s32.totalorder %s39_s12, %s752_s21  ;;  %p758_p5 = scmp.lt.s32.totalorder %s752_s21, %s752_s21 }
  0x13   :  { %p759_p6 = por %p758_p5, %p757_p4 }
  0x15   :  { %p760_p7 = pnand %p759_p6, %p753_p3 }
  0x17   :  { %763 = shalt.err (!%p760_p7)
}
  0x18   :  { %41 = dma.hbm_to_vmem [thread:$0]  %s1133_s1, 128, %s39_s12, [#allocation7]  }
  0x19   :  { %s764_s26 = scalar_lea.hbm %s1135_s3, 128 }
  0x1a   :  { %p765_p8 = scmp.ne.s32.totalorder %s1135_s3, %s764_s26  ;;  %p768_p9 = scmp.lt.u32.totalorder %s764_s26, %s1135_s3 }
  0x1c   :  { %p770_p10 = pnand %p768_p9, %p765_p8 }
  0x1e   :  { %773 = shalt.err (!%p770_p10)
}
  0x1f   :  { %s774_s10 = scalar_lea.vmem %s61_s14, 128  ;;  %p779_p12 = scmp.lt.s32.totalorder %s61_s14, %s61_s14 }
  0x20   :  { %p775_p11 = scmp.ne.s32.totalorder %s61_s14, %s774_s10  ;;  %p780_p13 = scmp.lt.s32.totalorder %s774_s10, %s774_s10 }
  0x22   :  { %p781_p0 = por %p780_p13, %p779_p12 }
  0x24   :  { %p782_p1 = pnand %p781_p0, %p775_p11 }
  0x26   :  { %785 = shalt.err (!%p782_p1)
}
  0x27   :  { %63 = dma.hbm_to_vmem [thread:$0]  %s1135_s3, 128, %s61_s14, [#allocation10]  }
  0x28   :  { %s954_s12 = smov [#allocation12]   ;;  %s955_s15 = smov [#allocation3]  }
  0x29   :  { %s79_s13 = sshll.u32 %s954_s12, 4  ;;  %s28_s16 = sshll.u32 %s955_s15, 4  ;;  %s80_s13 = int_to_ptr.vmem [resolvable:$true] %s79_s13  ;;  %s29_s16 = int_to_ptr.vmem [resolvable:$true] %s28_s16 }
  0x2a   :  { %s786_s19 = scalar_lea.hbm %s1137_s5, 4096 }
  0x2b   :  { %p787_p2 = scmp.ne.s32.totalorder %s1137_s5, %s786_s19  ;;  %p790_p3 = scmp.lt.u32.totalorder %s786_s19, %s1137_s5 }
  0x2d   :  { %p792_p4 = pnand %p790_p3, %p787_p2 }
  0x2f   :  { %795 = shalt.err (!%p792_p4)
}
  0x30   :  { %s796_s3 = scalar_lea.vmem %s80_s13, 4096  ;;  %p801_p6 = scmp.lt.s32.totalorder %s80_s13, %s80_s13 }
  0x31   :  { %p797_p5 = scmp.ne.s32.totalorder %s80_s13, %s796_s3  ;;  %p802_p7 = scmp.lt.s32.totalorder %s796_s3, %s796_s3 }
  0x33   :  { %p803_p8 = por %p802_p7, %p801_p6 }
  0x35   :  { %p804_p9 = pnand %p803_p8, %p797_p5 }
  0x37   :  { %807 = shalt.err (!%p804_p9)
}
  0x38   :  { %s956_s14 = smov 128   ;;  %s957_s23 = smov 8  }
  0x39   :  { %85 = dma.hbm_to_vmem [thread:$0]  %s1137_s5, 4096, %s80_s13, [#allocation13], %s956_s14, %s956_s14, %s957_s23  }
  0x3a   :  { %s808_s28 = scalar_lea.hbm %s1132_s0, 128 }
  0x3b   :  { %p809_p10 = scmp.ne.s32.totalorder %s1132_s0, %s808_s28  ;;  %p812_p11 = scmp.lt.u32.totalorder %s808_s28, %s1132_s0 }
  0x3d   :  { %p814_p12 = pnand %p812_p11, %p809_p10 }
  0x3f   :  { %817 = shalt.err (!%p814_p12)
}
  0x40   :  { %s818_s11 = scalar_lea.vmem %s29_s16, 128  ;;  %p823_p0 = scmp.lt.s32.totalorder %s29_s16, %s29_s16 }
  0x41   :  { %p819_p13 = scmp.ne.s32.totalorder %s29_s16, %s818_s11  ;;  %p824_p1 = scmp.lt.s32.totalorder %s818_s11, %s818_s11 }
  0x43   :  { %p825_p2 = por %p824_p1, %p823_p0 }
  0x45   :  { %p826_p3 = pnand %p825_p2, %p819_p13 }
  0x47   :  { %829 = shalt.err (!%p826_p3)
}
  0x48   :  { %31 = dma.hbm_to_vmem [thread:$0]  %s1132_s0, 128, %s29_s16, [#allocation4]  }
  0x49   :  { %s958_s13 = smov [#allocation8]   ;;  %s959_s17 = smov [#allocation11]  }
  0x4a   :  { %s47_s15 = sshll.u32 %s958_s13, 4  ;;  %s70_s18 = sshll.u32 %s959_s17, 4  ;;  %s48_s15 = int_to_ptr.vmem [resolvable:$true] %s47_s15  ;;  %s71_s18 = int_to_ptr.vmem [resolvable:$true] %s70_s18 }
  0x4b   :  { %s830_s20 = scalar_lea.hbm %s1134_s2, 384 }
  0x4c   :  { %p831_p4 = scmp.ne.s32.totalorder %s1134_s2, %s830_s20  ;;  %p834_p5 = scmp.lt.u32.totalorder %s830_s20, %s1134_s2 }
  0x4e   :  { %p836_p6 = pnand %p834_p5, %p831_p4 }
  0x50   :  { %839 = shalt.err (!%p836_p6)
}
  0x51   :  { %s840_s0 = scalar_lea.vmem %s48_s15, 384  ;;  %p845_p8 = scmp.lt.s32.totalorder %s48_s15, %s48_s15 }
  0x52   :  { %p841_p7 = scmp.ne.s32.totalorder %s48_s15, %s840_s0  ;;  %p846_p9 = scmp.lt.s32.totalorder %s840_s0, %s840_s0 }
  0x54   :  { %p847_p10 = por %p846_p9, %p845_p8 }
  0x56   :  { %p848_p11 = pnand %p847_p10, %p841_p7 }
  0x58   :  { %851 = shalt.err (!%p848_p11)
}
  0x59   :  { %53 = dma.hbm_to_vmem [thread:$0]  %s1134_s2, 384, %s48_s15, [#allocation7], %s956_s14, %s956_s14, %s957_s23  }
  0x5a   :  { %s852_s28 = scalar_lea.hbm %s1136_s4, 32 }
  0x5b   :  { %p853_p12 = scmp.ne.s32.totalorder %s1136_s4, %s852_s28  ;;  %p856_p13 = scmp.lt.u32.totalorder %s852_s28, %s1136_s4 }
  0x5d   :  { %p858_p0 = pnand %p856_p13, %p853_p12 }
  0x5f   :  { %861 = shalt.err (!%p858_p0)
}
  0x60   :  { %s862_s11 = scalar_lea.vmem %s71_s18, 32  ;;  %p867_p2 = scmp.lt.s32.totalorder %s71_s18, %s71_s18 }
  0x61   :  { %p863_p1 = scmp.ne.s32.totalorder %s71_s18, %s862_s11  ;;  %p868_p3 = scmp.lt.s32.totalorder %s862_s11, %s862_s11 }
  0x63   :  { %p869_p4 = por %p868_p3, %p867_p2 }
  0x65   :  { %p870_p5 = pnand %p869_p4, %p863_p1 }
  0x67   :  { %873 = shalt.err (!%p870_p5)
}
  0x68   :  { %73 = dma.hbm_to_vmem [thread:$0]  %s1136_s4, 32, %s71_s18, [#allocation10]  }
  0x69   :  { %s960_s23 = smov [#allocation14]   ;;  %s961_s12 = smov [#allocation15]  }
  0x6a   :  { %s92_s5 = sshll.u32 %s960_s23, 4  ;;  %s102_s13 = sshll.u32 %s961_s12, 4  ;;  %s93_s5 = int_to_ptr.vmem [resolvable:$true] %s92_s5  ;;  %s103_s13 = int_to_ptr.vmem [resolvable:$true] %s102_s13 }
  0x6b   :  { %s874_s19 = scalar_lea.hbm %s1138_s6, 32 }
  0x6c   :  { %p875_p6 = scmp.ne.s32.totalorder %s1138_s6, %s874_s19  ;;  %p878_p7 = scmp.lt.u32.totalorder %s874_s19, %s1138_s6 }
  0x6e   :  { %p880_p8 = pnand %p878_p7, %p875_p6 }
  0x70   :  { %883 = shalt.err (!%p880_p8)
}
  0x71   :  { %s884_s4 = scalar_lea.vmem %s93_s5, 32  ;;  %p889_p10 = scmp.lt.s32.totalorder %s93_s5, %s93_s5 }
  0x72   :  { %p885_p9 = scmp.ne.s32.totalorder %s93_s5, %s884_s4  ;;  %p890_p11 = scmp.lt.s32.totalorder %s884_s4, %s884_s4 }
  0x74   :  { %p891_p12 = por %p890_p11, %p889_p10 }
  0x76   :  { %p892_p13 = pnand %p891_p12, %p885_p9 }
  0x78   :  { %895 = shalt.err (!%p892_p13)
}
  0x79   :  { %95 = dma.hbm_to_vmem [thread:$0]  %s1138_s6, 32, %s93_s5, [#allocation13]  }
  0x7a   :  { %s896_s16 = scalar_lea.hbm %s1139_s7, 32 }
  0x7b   :  { %p897_p0 = scmp.ne.s32.totalorder %s1139_s7, %s896_s16  ;;  %p900_p1 = scmp.lt.u32.totalorder %s896_s16, %s1139_s7 }
  0x7d   :  { %p902_p2 = pnand %p900_p1, %p897_p0 }
  0x7f   :  { %905 = shalt.err (!%p902_p2)
}
  0x80   :  { %s906_s29 = scalar_lea.vmem %s103_s13, 32  ;;  %p911_p4 = scmp.lt.s32.totalorder %s103_s13, %s103_s13 }
  0x81   :  { %p907_p3 = scmp.ne.s32.totalorder %s103_s13, %s906_s29  ;;  %p912_p5 = scmp.lt.s32.totalorder %s906_s29, %s906_s29 }
  0x83   :  { %p913_p6 = por %p912_p5, %p911_p4 }
  0x85   :  { %p914_p7 = pnand %p913_p6, %p907_p3 }
  0x87   :  { %917 = shalt.err (!%p914_p7)
}
  0x88   :  { %105 = dma.hbm_to_vmem [thread:$0]  %s1139_s7, 32, %s103_s13, [#allocation16]  }
  0x89   :  { %940 = dma.done.wait [#allocation4], 128  }
  0x8a   :  { %941 = vsyncadd [#allocation4], 4294967168 }
  0x8b   :  { %942 = dma.done.wait [#allocation7], 512  }
  0x8c   :  { %943 = vsyncadd [#allocation7], 4294966784 }
  0x8d   :  { %944 = dma.done.wait [#allocation10], 160  }
  0x8e   :  { %945 = vsyncadd [#allocation10], 4294967136 }
  0x8f   :  { %946 = dma.done.wait [#allocation13], 4128  }
  0x90   :  { %947 = vsyncadd [#allocation13], 4294963168 }
  0x91   :  { %948 = dma.done.wait [#allocation16], 32  }
  0x92   :  { %949 = vsyncadd [#allocation16], 4294967264  ;;  %v962_v1 = vmov 0   ;;  %vm217_vm0 = vcmask 1040384   ;;  %v140_v2 = vld [vmem:[#allocation9] sm:$0x77]  ;;  %v269_v50 = vlaneseq }
  0x93   :  { %189 = vmatprep.mubr.bf16.mxu1 %v962_v1  ;;  %686 = vset.pattern.permute.xlu0 %v962_v1  ;;  %vm150_vm1 = vcmask 1042432   ;;  %v135_v3 = vld [vmem:[#allocation6] sm:$0xff]  ;;  %v632_v4 = vcombine.high %v140_v2, %v140_v2  ;;  %v631_v5 = vcombine.low %v140_v2, %v140_v2  ;;  %v691_v6 = vld [vmem:[#allocation8 + $0x4] ss:$8 sps:$4 sm:$0xff]   ;;  %v689_v7 = vld [vmem:[#allocation8] ss:$8 sps:$4 sm:$0xff]  }
  0x94   :  { %v139_v8 = vld [vmem:[#allocation8 + $0x10] sm:$0x11]  ;;  %v219_v9 = vsel %vm217_vm0, 65535, %v962_v1  ;;  %v136_v11 = vpack.c.bf16 %v135_v3, %v135_v3  ;;  %v696_v14 = vld [vmem:[#allocation12] ss:$8 sps:$4 sm:$0xff]   ;;  %vm146_vm2 = vcmask 48128  }
  0x95   :  { %633 = vmatprep.subr.msk.bf16.mxu1 %vm150_vm1, %v632_v4  ;;  %v152_v10 = vsel %vm150_vm1, %v631_v5, 0  ;;  %v638_v12 = vcombine.high %v139_v8, %v139_v8  ;;  %v694_v13 = vld [vmem:[#allocation12 + $0x4] ss:$8 sps:$4 sm:$0xff]   ;;  %v637_v15 = vcombine.low %v139_v8, %v139_v8  ;;  %v697_v16 = vld [vmem:[#allocation12 + $0x14] ss:$8 sps:$4 sm:$0xff]   ;;  %vm213_vm3 = vcmask 138240  }
  0x96   :  { %158 = vmatpush1.bf16.msra.mxu1 %v152_v10  ;;  %489 = vmatprep.subr.bf16.mxu0 %v694_v13  ;;  %v699_v18 = vld [vmem:[#allocation12 + $0x10] ss:$8 sps:$4 sm:$0xff]   ;;  %v700_v19 = vld [vmem:[#allocation12 + $0x24] ss:$8 sps:$4 sm:$0xff]   ;;  %v702_v22 = vld [vmem:[#allocation12 + $0x20] ss:$8 sps:$4 sm:$0xff]  }
  0x97   :  { %226 = vmatprep.subr.bf16.mxu1 %v691_v6  ;;  %v224_v17 = vand.u32 %v638_v12, %v219_v9  ;;  %490 = vmatpush1.bf16.msra.mxu0 %v696_v14  ;;  %v221_v20 = vand.u32 %v637_v15, %v219_v9  ;;  %v133_v21 = vld [vmem:[#allocation3] sm:$0xff]  ;;  %v708_v27 = vld [vmem:[#allocation12 + $0x40] ss:$8 sps:$4 sm:$0xff]   ;;  %v270_v51 = vshrl.u32 %v269_v50, 7  ;;  %v267_v57 = vld [vmem:[#allocation11] sm:$0x3] }
  0x98   :  { %491 = vmatprep.subr.bf16.mxu0 %v697_v16  ;;  %v134_v23 = vpack.c.bf16 %v133_v21, %v133_v21  ;;  %v703_v24 = vld [vmem:[#allocation12 + $0x34] ss:$8 sps:$4 sm:$0xff]   ;;  %v705_v25 = vld [vmem:[#allocation12 + $0x30] ss:$8 sps:$4 sm:$0xff]   ;;  %v706_v26 = vld [vmem:[#allocation12 + $0x44] ss:$8 sps:$4 sm:$0xff]  }
  0x99   :  { %634 = vmatmul.mubr.msk.bf16.vlgmr.msra.gmra.mrb[0].mxu1 %vm146_vm2, %v136_v11  ;;  %v709_v28 = vld [vmem:[#allocation12 + $0x54] ss:$8 sps:$4 sm:$0xff]   ;;  %v711_v29 = vld [vmem:[#allocation12 + $0x50] ss:$8 sps:$4 sm:$0xff]   ;;  %v712_v30 = vld [vmem:[#allocation12 + $0x64] ss:$8 sps:$4 sm:$0xff]  }
  0x9a   :  { %227 = vmatpush1.bf16.msra.mxu1 %v689_v7  ;;  %258 = vmatprep.mubr.bf16.mxu1 %v962_v1  ;;  %v714_v31 = vld [vmem:[#allocation12 + $0x60] ss:$8 sps:$4 sm:$0xff]   ;;  %v715_v32 = vld [vmem:[#allocation12 + $0x74] ss:$8 sps:$4 sm:$0xff]   ;;  %v717_v33 = vld [vmem:[#allocation12 + $0x70] ss:$8 sps:$4 sm:$0xff]  }
  0x9b   :  { %228 = vmatprep.subr.bf16.mxu1 %v224_v17  ;;  %492 = vmatpush1.bf16.msra.mxu0 %v699_v18  ;;  %v718_v34 = vld [vmem:[#allocation12 + $0x84] ss:$8 sps:$4 sm:$0xff]   ;;  %v720_v35 = vld [vmem:[#allocation12 + $0x80] ss:$8 sps:$4 sm:$0xff]   ;;  %v721_v36 = vld [vmem:[#allocation12 + $0x94] ss:$8 sps:$4 sm:$0xff]  }
  0x9c   :  { %493 = vmatprep.subr.bf16.mxu0 %v700_v19  ;;  %v723_v37 = vld [vmem:[#allocation12 + $0x90] ss:$8 sps:$4 sm:$0xff]   ;;  %v724_v38 = vld [vmem:[#allocation12 + $0xa4] ss:$8 sps:$4 sm:$0xff]   ;;  %v726_v39 = vld [vmem:[#allocation12 + $0xa0] ss:$8 sps:$4 sm:$0xff]  }
  0x9d   :  { %v727_v40 = vld [vmem:[#allocation12 + $0xb4] ss:$8 sps:$4 sm:$0xff]   ;;  %v729_v41 = vld [vmem:[#allocation12 + $0xb0] ss:$8 sps:$4 sm:$0xff]   ;;  %v730_v42 = vld [vmem:[#allocation12 + $0xc4] ss:$8 sps:$4 sm:$0xff]  }
  0x9e   :  { %229 = vmatpush1.bf16.msra.mxu1 %v221_v20  ;;  %v732_v43 = vld [vmem:[#allocation12 + $0xc0] ss:$8 sps:$4 sm:$0xff]   ;;  %v733_v44 = vld [vmem:[#allocation12 + $0xd4] ss:$8 sps:$4 sm:$0xff]   ;;  %v735_v45 = vld [vmem:[#allocation12 + $0xd0] ss:$8 sps:$4 sm:$0xff]  }
  0x9f   :  { %494 = vmatpush1.bf16.msra.mxu0 %v702_v22  ;;  %v736_v46 = vld [vmem:[#allocation12 + $0xe4] ss:$8 sps:$4 sm:$0xff]   ;;  %v738_v47 = vld [vmem:[#allocation12 + $0xe0] ss:$8 sps:$4 sm:$0xff]   ;;  %v739_v48 = vld [vmem:[#allocation12 + $0xf4] ss:$8 sps:$4 sm:$0xff]  }
  0xa0   :  { %495 = vmatprep.subr.bf16.mxu0 %v703_v24  ;;  %v741_v49 = vld [vmem:[#allocation12 + $0xf0] ss:$8 sps:$4 sm:$0xff]   ;;  %v271_v56 = vsub.s32 0, %v270_v51  ;;  %v275_v58 = vsub.s32 1, %v270_v51  ;;  %v963_v9 = vmov 1966171168  }
  0xa1   :  { %639 = vmatmul.mubr.msk.bf16.vlgmr.msra.gmra.mrb[4].mxu1 %vm213_vm3, %v134_v23  ;;  %v555_v10 = vunpack.c.l.s4 %v963_v9  ;;  %v672_v11 = vld.sshfl [vmem:[#allocation15] sm:$0x11 pattern:$0x75316420]  ;;  %v535_v17 = vld [vmem:[#allocation2] sm:$0x1] }
  0xa2   :  { %v272_v59 = vrot.slane %v267_v57, %v271_v56  ;;  %v276_v61 = vrot.slane %v267_v57, %v275_v58  ;;  %v553_v13 = vcombine.high %v672_v11, %v672_v11  ;;  %538 = vperm.xlu0 %686, %v535_v17   ;;  %v317_v18 = vld [vmem:[#allocation14] sm:$0x3]  ;;  %s964_s7 = smov [#allocation17]   ;;  %vm610_vm4 = vcmask 57344  }
  0xa3   :  { %496 = vmatpush1.bf16.msra.mxu0 %v705_v25  ;;  %v556_v12 = vunpack.c.0.s8 %v555_v10  ;;  %v322_v19 = vrot.slane %v317_v18, %v271_v56  ;;  %v326_v20 = vrot.slane %v317_v18, %v275_v58  ;;  %s618_s10 = sshll.u32 %s964_s7, 4  ;;  %s619_s10 = int_to_ptr.vmem [resolvable:$true] %s618_s10 }
  0xa4   :  { %497 = vmatprep.subr.bf16.mxu0 %v706_v26  ;;  %s918_s1 = scalar_lea.vmem %s619_s10, 16  ;;  %s922_s11 = scalar_lea.vmem %s619_s10, 32 }
  0xa5   :  { %v559_v14 = vsub.s32 %v556_v12, %v270_v51  ;;  %p919_p8 = scmp.ne.s32.totalorder %s619_s10, %s918_s1  ;;  %p923_p9 = scmp.lt.s32.totalorder %s619_s10, %s619_s10 }
  0xa6   :  { %p924_p10 = scmp.lt.s32.totalorder %s922_s11, %s918_s1 }
  0xa7   :  { %498 = vmatpush1.bf16.msra.mxu0 %v708_v27  ;;  %v567_v15 = vrot.slane %v553_v13, %v559_v14  ;;  %v560_v16 = vrot.slane %v672_v11, %v559_v14 }
  0xa8   :  { %499 = vmatprep.subr.bf16.mxu0 %v709_v28  ;;  %p925_p11 = por %p924_p10, %p923_p9 }
  0xa9   :  { %602 = vmatprep.mubr.bf16.mxu1 %v567_v15 }
  0xaa   :  { %p926_p12 = pnand %p925_p11, %p919_p8 }
  0xab   :  { %500 = vmatpush1.bf16.msra.mxu0 %v711_v29 }
  0xac   :  { %501 = vmatprep.subr.bf16.mxu0 %v712_v30 }
  0xaf   :  { %502 = vmatpush1.bf16.msra.mxu0 %v714_v31 }
  0xb0   :  { %503 = vmatprep.subr.bf16.mxu0 %v715_v32 }
  0xb3   :  { %504 = vmatpush1.bf16.msra.mxu0 %v717_v33 }
  0xb4   :  { %505 = vmatprep.subr.bf16.mxu0 %v718_v34 }
  0xb7   :  { %506 = vmatpush1.bf16.msra.mxu0 %v720_v35 }
  0xb8   :  { %507 = vmatprep.subr.bf16.mxu0 %v721_v36 }
  0xbb   :  { %508 = vmatpush1.bf16.msra.mxu0 %v723_v37 }
  0xbc   :  { %509 = vmatprep.subr.bf16.mxu0 %v724_v38 }
  0xbf   :  { %510 = vmatpush1.bf16.msra.mxu0 %v726_v39 }
  0xc0   :  { %511 = vmatprep.subr.bf16.mxu0 %v727_v40 }
  0xc3   :  { %512 = vmatpush1.bf16.msra.mxu0 %v729_v41 }
  0xc4   :  { %513 = vmatprep.subr.bf16.mxu0 %v730_v42 }
  0xc7   :  { %514 = vmatpush1.bf16.msra.mxu0 %v732_v43 }
  0xc8   :  { %515 = vmatprep.subr.bf16.mxu0 %v733_v44 }
  0xcb   :  { %516 = vmatpush1.bf16.msra.mxu0 %v735_v45 }
  0xcc   :  { %517 = vmatprep.subr.bf16.mxu0 %v736_v46 }
  0xcf   :  { %518 = vmatpush1.bf16.msra.mxu0 %v738_v47 }
  0xd0   :  { %519 = vmatprep.subr.bf16.mxu0 %v739_v48 }
  0xd3   :  { %520 = vmatpush1.bf16.msra.mxu0 %v741_v49 }
 0x121   :  { %v539_v31 = vpop.permute.xlu0 %538 }
 0x122   :  { %v544_v32 = vrot.slane %v539_v31, %v271_v56 }
 0x16c   :  { %v191_v52 = vpop.f32.mrb[0].mxu1 }
 0x16d   :  { %v193_v53 = vpop.f32.mrb[1].mxu1 }
 0x16e   :  { %v195_v54 = vpop.f32.mrb[2].mxu1 }
 0x16f   :  { %v196_v55 = vpop.f32.mrb[3].mxu1 }
 0x174   :  { %v260_v60 = vpop.f32.mrb[4].mxu1 }
 0x175   :  { %v261_v62 = vadd.f32 %v260_v60, %v191_v52  ;;  %v262_v63 = vpop.f32.mrb[5].mxu1 }
 0x176   :  { %v263_v0 = vadd.f32 %v262_v63, %v193_v53  ;;  %v264_v1 = vpop.f32.mrb[6].mxu1 }
 0x177   :  { %v279_v2 = vadd.f32 %v272_v59, %v261_v62  ;;  %v265_v3 = vpop.f32.mrb[7].mxu1 }
 0x178   :  { %v280_v4 = vadd.f32 %v276_v61, %v263_v0 }
 0x179   :  { %v281_v5 = vmax.f32 %v279_v2, 0.0 }
 0x17a   :  { %v282_v6 = vmax.f32 %v280_v4, 0.0 }
 0x17b   :  { %v283_v8 = vpack.c.bf16 %v281_v5, %v281_v5 }
 0x17c   :  { %v284_v7 = vpack.c.bf16 %v282_v6, %v282_v6 }
 0x17e   :  { %521 = vmatprep.mubr.bf16.mxu0 %v284_v7 }
 0x17f   :  { %522 = vmatmul.mubr.bf16.vlgmr.msra.gmra.mrb[0].mxu0 %v283_v8 }
 0x252   :  { %v523_v21 = vpop.f32.mrb[0].mxu0 }
 0x253   :  { %v524_v22 = vadd.f32 %v523_v21, %v322_v19  ;;  %v525_v23 = vpop.f32.mrb[1].mxu0 }
 0x254   :  { %v526_v24 = vadd.f32 %v525_v23, %v326_v20  ;;  %v527_v25 = vpop.f32.mrb[2].mxu0 }
 0x255   :  { %v530_v26 = vmax.f32 %v524_v22, 0.0  ;;  %v528_v27 = vpop.f32.mrb[3].mxu0 }
 0x256   :  { %v531_v28 = vmax.f32 %v526_v24, 0.0 }
 0x257   :  { %v533_v30 = vpack.c.bf16 %v530_v26, %v530_v26 }
 0x258   :  { %v534_v29 = vpack.c.bf16 %v531_v28, %v531_v28 }
 0x25a   :  { %570 = vmatprep.subr.bf16.mxu1 %v534_v29 }
 0x25b   :  { %571 = vmatpush1.bf16.xpose.msra.mxu1 %v533_v30 }
 0x262   :  { %603 = vmatmul.mubr.bf16.vlgmr.msra.gmra.mrb[8].mxu1 %v560_v16 }
 0x335   :  { %v604_v33 = vpop.f32.mrb[8].mxu1 }
 0x336   :  { %v605_v34 = vadd.f32 %v604_v33, %v544_v32  ;;  %v606_v35 = vpop.f32.mrb[9].mxu1 }
 0x337   :  { %v607_v36 = vpop.f32.mrb[10].mxu1 }
 0x338   :  { %v608_v37 = vpop.f32.mrb[11].mxu1  ;;  %611 = vst.msk [vmem:[#allocation17] sm:$0x1] %vm610_vm4, %v605_v34 }
 0x339   :  { %929 = shalt.err (!%p926_p12)
}
 0x33a   :  { %s930_s23 = scalar_lea.hbm %s1141_s9, 16 }
 0x33b   :  { %p931_p13 = scmp.ne.s32.totalorder %s1141_s9, %s930_s23  ;;  %p934_p0 = scmp.lt.u32.totalorder %s930_s23, %s1141_s9 }
 0x33d   :  { %p936_p1 = pnand %p934_p0, %p931_p13 }
 0x33f   :  { %939 = shalt.err (!%p936_p1)
}
 0x340   :  { %621 = dma.vmem_to_hbm [thread:$0]  %s619_s10, 16, %s1141_s9, [#allocation5]  }
 0x341   :  { %950 = dma.done.wait [#allocation5], 16  }
 0x342   :  { %951 = vsyncadd [#allocation5], 4294967280 }
 0x343   :  { %625 = vsyncpa [#allocation4], 1 }
 0x344   :  { %626 = vsyncpa [#allocation7], 1 }
 0x345   :  { %627 = vsyncpa [#allocation10], 1 }
 0x346   :  { %628 = vsyncpa [#allocation13], 1 }
 0x347   :  { %629 = vsyncpa [#allocation16], 1 }
 0x348   :  { %630 = vsyncpa [#allocation5], 1 }

</bundles_post_ra>
